<compile_context>
chip_gen: v7x
topology: tpu7x:2x2x1
jax: 0.10.0
libtpu: 0.0.40
codegen_flags: <defaults>
</compile_context>

<pallas_src>
import jax
import jax.numpy as jnp
from jax import lax
from jax.experimental import pallas as pl
from jax.experimental.pallas import tpu as pltpu

# ---- small, module-consistent shapes -------------------------------------
B = 256                     # batch (>=128 so the MXU M dimension is full)
C_IN, H, W = 3, 16, 16      # NCHW image
PATCH = 8
P = (H // PATCH) * (W // PATCH)          # 4 patches
PATCH_DIM = C_IN * PATCH * PATCH         # 192
OUT_DIM = 32                # backbone.out_dim (768 for the real ViT-B/16)
TOTAL_CLS = 16              # total_cls (100 in the reference)
C1 = TOTAL_CLS - 1          # dsimplex input dim

B_TILE = 128                # batch tile: grid=2 -> one tile per v7x TensorCore
LANE = 128                  # lane-dense output width (feat: 0..31, logits: 32..47)

COMPUTE_DTYPE = jnp.bfloat16  # MXU operand dtype (accumulation stays f32)


def dsimplex_weights(total_cls, dtype=jnp.float32):
    """Exact port of SimplexEaseNet.dsimplex / simplex_coordinates."""
    n = total_cls - 1
    t = jnp.zeros((n + 1, n), dtype=dtype)
    t = t.at[:-1, :].set(jnp.eye(n, dtype=dtype))
    val = (1.0 - jnp.sqrt(1.0 + jnp.asarray(float(n), dtype=dtype))) / n
    t = t.at[-1, :].add(val)
    t = t - jnp.mean(t, axis=0)
    t = t / (jnp.linalg.norm(t, ord=2, axis=1, keepdims=True) + 1e-8)
    return t  # (total_cls, total_cls - 1) == dsimplex_layer.weight


def prepare_params(w_embed, w_junction, w_dsimplex, compute_dtype=COMPUTE_DTYPE):
    """One-time (param-load-time) weight prep: full fusion + lane packing.

    W_full = W_embed @ Wj^T @ Wd^T  (all contractions in f32, no transposed
    copies materialized in HBM thanks to dot_general dimension_numbers).
    W_combo packs [W_embed | W_full | 0] along 128 lanes so the kernel is a
    single matmul producing features and logits side by side.
    """
    # (OUT_DIM, TOTAL_CLS): contract the shared (total_cls-1) axis directly.
    w_head = lax.dot_general(
        w_junction, w_dsimplex,
        dimension_numbers=(((0,), (1,)), ((), ())),
        preferred_element_type=jnp.float32)
    # (PATCH_DIM, TOTAL_CLS)
    w_full = jnp.dot(w_embed, w_head, preferred_element_type=jnp.float32)
    w_combo = jnp.zeros((PATCH_DIM, LANE), jnp.float32)
    w_combo = w_combo.at[:, :OUT_DIM].set(w_embed)                          # features
    w_combo = w_combo.at[:, OUT_DIM:OUT_DIM + TOTAL_CLS].set(w_full)        # logits
    return w_combo.astype(compute_dtype)


def simplex_ease_kernel(pmean_ref, wcombo_ref, out_ref):
    # pmean: (B_TILE, PATCH_DIM) bf16; wcombo: (PATCH_DIM, 128) bf16.
    # One MXU pass produces both features (lanes 0..31) and logits (32..47),
    # accumulated in f32 and stored as a single lane-dense slab.
    out_ref[...] = jnp.dot(
        pmean_ref[...], wcombo_ref[...],
        preferred_element_type=jnp.float32).astype(out_ref.dtype)


@jax.jit
def simplex_ease_forward(x_nchw, w_combo):
    """Returns {'logits': (B, total_cls), 'features': (B, out_dim)}."""
    b, c, h, w = x_nchw.shape
    # Patch mean without materializing a transposed (B, P, PATCH_DIM) array:
    # mean over the patch-grid axes of the 6-D view; flat order (c, ph, pw)
    # is identical to the conv-style patch flatten used by the reference.
    pmean = x_nchw.reshape(b, c, h // PATCH, PATCH, w // PATCH, PATCH)
    pmean = pmean.mean(axis=(2, 4)).reshape(b, c * PATCH * PATCH)   # (B, PATCH_DIM)
    pmean = pmean.astype(w_combo.dtype)

    # Pad batch to a multiple of the batch tile (no-op when b % B_TILE == 0).
    b_pad = ((b + B_TILE - 1) // B_TILE) * B_TILE
    if b_pad != b:
        pmean = jnp.pad(pmean, ((0, b_pad - b), (0, 0)))

    itemsize = jnp.dtype(w_combo.dtype).itemsize
    out = pl.pallas_call(
        simplex_ease_kernel,
        grid=(b_pad // B_TILE,),
        in_specs=[
            pl.BlockSpec((B_TILE, PATCH_DIM), lambda i: (i, 0),
                         memory_space=pltpu.MemorySpace.VMEM),
            pl.BlockSpec((PATCH_DIM, LANE), lambda i: (0, 0),
                         memory_space=pltpu.MemorySpace.VMEM),
        ],
        out_specs=pl.BlockSpec((B_TILE, LANE), lambda i: (i, 0),
                               memory_space=pltpu.MemorySpace.VMEM),
        out_shape=jax.ShapeDtypeStruct((b_pad, LANE), jnp.float32),
        compiler_params=pltpu.CompilerParams(
            dimension_semantics=("parallel",)),
        cost_estimate=pl.CostEstimate(
            flops=2 * b_pad * PATCH_DIM * LANE,
            transcendentals=0,
            bytes_accessed=(b_pad * PATCH_DIM * itemsize          # pmean in
                            + PATCH_DIM * LANE * itemsize          # weights in
                            + b_pad * LANE * 4)),                  # f32 slab out
    )(pmean, w_combo)

    # Features occupy lanes 0..31, logits lanes 32..47 of the fused slab.
    return {
        'logits': out[:b, OUT_DIM:OUT_DIM + TOTAL_CLS],
        'features': out[:b, :OUT_DIM],
    }


def reference_forward(x_nchw, w_embed, w_junction, w_dsimplex):
    """Pure-JAX f32 reference mirroring the PyTorch forward (test=False)."""
    b, c, h, w = x_nchw.shape
    ph = pw = PATCH
    patches = x_nchw.reshape(b, c, h // ph, ph, w // pw, pw)
    patches = patches.transpose(0, 2, 4, 1, 3, 5).reshape(
        b, (h // ph) * (w // pw), c * ph * pw)
    feat = jnp.mean(patches @ w_embed, axis=1)          # backbone stand-in
    out = feat @ w_junction.T                           # junction_list[cur_task]
    out = out @ w_dsimplex.T                            # dsimplex_layer
    return out, feat


if __name__ == "__main__":
    key = jax.random.PRNGKey(0)
    k_x, k_emb, k_j = jax.random.split(key, 3)

    x = jax.random.normal(k_x, (B, C_IN, H, W), dtype=jnp.float32)

    # Deterministic parameter init (synthetic; not a checkpoint load).
    w_embed = jax.random.normal(k_emb, (PATCH_DIM, OUT_DIM), jnp.float32) * 0.02
    # junction_list[-1].weight: (total_cls-1, out_dim), kaiming-ish uniform scale
    lim = (1.0 / OUT_DIM) ** 0.5
    w_junction = jax.random.uniform(k_j, (C1, OUT_DIM), jnp.float32, -lim, lim)
    # dsimplex_layer.weight: fixed, exactly as in the module
    w_dsimplex = dsimplex_weights(TOTAL_CLS)            # (total_cls, total_cls-1)

    # One-time weight prep (full fusion + lane packing + bf16 cast).
    w_combo = prepare_params(w_embed, w_junction, w_dsimplex)

    out = simplex_ease_forward(x, w_combo)
    jax.block_until_ready(out)

    ref_logits, ref_feat = reference_forward(x, w_embed, w_junction, w_dsimplex)
    assert out['logits'].shape == (B, TOTAL_CLS)
    assert out['features'].shape == (B, OUT_DIM)
    # bf16 MXU operands + weight-chain reassociation: tolerance relaxed vs the
    # f32 reference (observed error is ~1e-3 at these magnitudes).
    assert jnp.allclose(out['logits'], ref_logits, atol=2e-2, rtol=2e-2)
    assert jnp.allclose(out['features'], ref_feat, atol=2e-2, rtol=2e-2)

    print("KERNEL_OK")
</pallas_src>

<mosaic_0001>
module attributes {stable_mosaic.version = 11 : i64} {
  func.func @simplex_ease_kernel(%arg0: i32, %arg1: memref<128x192xbf16, #tpu.memory_space<vmem>>, %arg2: memref<192x128xbf16, #tpu.memory_space<vmem>>, %arg3: memref<128x128xf32, #tpu.memory_space<vmem>>) attributes {dimension_semantics = [#tpu.dimension_semantics<parallel>], iteration_bounds = array<i64: 2>, scalar_prefetch = 0 : i64, scratch_operands = 0 : i64, tpu.core_type = #tpu.core_type<tc>, window_params = [{transform_indices = @transform_0, window_bounds = array<i64: 128, 192>}, {pipeline_mode = #tpu.pipeline_mode<synchronous>, transform_indices = @transform_1, window_bounds = array<i64: 192, 128>}, {transform_indices = @transform_2, window_bounds = array<i64: 128, 128>}]} {
    %c0 = arith.constant 0 : index
    %c0_0 = arith.constant 0 : index
    %0 = vector.load %arg1[%c0, %c0_0] : memref<128x192xbf16, #tpu.memory_space<vmem>>, vector<128x192xbf16>
    %c0_1 = arith.constant 0 : index
    %c0_2 = arith.constant 0 : index
    %1 = vector.load %arg2[%c0_1, %c0_2] : memref<192x128xbf16, #tpu.memory_space<vmem>>, vector<192x128xbf16>
    %cst = arith.constant dense<0.000000e+00> : vector<128x128xf32>
    %2 = tpu.matmul %0, %1, %cst {dimension_numbers = #tpu.dot_dimension_numbers<[1], [0], [0], [1], [0, 0, 1, 1], [], []>} : vector<128x192xbf16>, vector<192x128xbf16>, vector<128x128xf32> -> vector<128x128xf32>
    %c0_3 = arith.constant 0 : index
    %c0_4 = arith.constant 0 : index
    %3 = vector.load %arg3[%c0_3, %c0_4] : memref<128x128xf32, #tpu.memory_space<vmem>>, vector<128x128xf32>
    tpu.vector_store %arg3[%c0_3, %c0_4], %2 {strides = array<i32>} : memref<128x128xf32, #tpu.memory_space<vmem>>, vector<128x128xf32>,
    return
  }
  func.func @transform_0(%arg0: i32) -> (i32, i32) {
    %c0_i32 = arith.constant 0 : i32
    %c0_i32_0 = arith.constant 0 : i32
    return %arg0, %c0_i32 : i32, i32
  }
  func.func @transform_1(%arg0: i32) -> (i32, i32) {
    %c0_i32 = arith.constant 0 : i32
    %c0_i32_0 = arith.constant 0 : i32
    %c0_i32_1 = arith.constant 0 : i32
    return %c0_i32, %c0_i32_0 : i32, i32
  }
  func.func @transform_2(%arg0: i32) -> (i32, i32) {
    %c0_i32 = arith.constant 0 : i32
    %c0_i32_0 = arith.constant 0 : i32
    return %arg0, %c0_i32 : i32, i32
  }
}

</mosaic_0001>

<bundles_post_ra>
// kernel: simplex_ease_forward.1
= control target key start
LH: loop header
LB: loop body
LE: loop exit
PB: predicated region body
PF: predicated region fallthrough
CT: control target
= control target key end

     0   :  { %s671_s9 = smov 0   ;;  %s799_s0 = inlined_call_operand.vmem [shape: bf16[256,192], index: 0, kind: input, shape index: {}]   ;;  %s800_s1 = inlined_call_operand.vmem [shape: bf16[192,128], index: 1, kind: input, shape index: {}]   ;;  %s801_s2 = inlined_call_operand.vmem [shape: f32[256,128], index: 2, kind: output, shape index: {}]  }
   0x1 LB: > { %s529_s10 = sadd.s32 4294967295, %s653_s9   ;;  %p533_p0 = scmp.ge.s32.totalorder %s653_s9, 1  ;;  %s653_s9 = sphi %s671_s9, %s12_s9  }
   0x2   : > { %p114_p1 = scmp.lt.s32.totalorder %s653_s9, 3 }
   0x4   : > { %p115_p2 = pnand %p533_p0, %p114_p1 }
   0x5   : > { %v611_v0 = vld [vmem:[%s800_s1] sm:$0xff] (!%p115_p2)   ;;  %v655_v1 = vmov (!%p115_p2), 0   ;;  %s534_s13 = sshll.u32 (!%p115_p2), %s529_s10, 4  ;;  %v612_v2 = vld [vmem:[%s800_s1 + $0x8] sm:$0xff] (!%p115_p2)   ;;  %v613_v3 = vld [vmem:[%s800_s1 + $0x10] sm:$0xff] (!%p115_p2)   ;;  %vm335_vm0 = vcmask (!%p115_p2), 523264  }
   0x6   : > { %118 = sbr.rel (%p115_p2) target bundleno = 293 (0x125), region = 28  ;;  %360 = vmatprep.subr.bf16.mxu0 (!%p115_p2), %v655_v1  ;;  %578 = vmatprep.subr.bf16.mxu1 (!%p115_p2), %v655_v1  ;;  %p138_p3 = scmp.lt.s32.totalorder (!%p115_p2), %s534_s13, 31  ;;  %v614_v4 = vld [vmem:[%s800_s1 + $0x18] sm:$0xff] (!%p115_p2)   ;;  %v615_v6 = vld [vmem:[%s800_s1 + $0x20] sm:$0xff] (!%p115_p2)   ;;  %v616_v8 = vld [vmem:[%s800_s1 + $0x28] sm:$0xff] (!%p115_p2)  }
   0x7   : > { %361 = vmatpush1.bf16.msra.mxu0 (!%p115_p2), %v611_v0  ;;  %590 = vmatpush1.bf16.msra.mxu1 (!%p115_p2), %v611_v0  ;;  %v617_v9 = vld [vmem:[%s800_s1 + $0x30] sm:$0xff] (!%p115_p2)   ;;  %v618_v10 = vld [vmem:[%s800_s1 + $0x38] sm:$0xff] (!%p115_p2)   ;;  %v619_v11 = vld [vmem:[%s800_s1 + $0x40] sm:$0xff] (!%p115_p2)  }
   0x8   : > { %362 = vmatprep.subr.bf16.mxu0 (!%p115_p2), %v655_v1  ;;  %579 = vmatprep.subr.bf16.mxu1 (!%p115_p2), %v655_v1  ;;  %v620_v12 = vld [vmem:[%s800_s1 + $0x48] sm:$0xff] (!%p115_p2)   ;;  %v621_v13 = vld [vmem:[%s800_s1 + $0x50] sm:$0xff] (!%p115_p2)   ;;  %v622_v14 = vld [vmem:[%s800_s1 + $0x58] sm:$0xff] (!%p115_p2)  }
   0xb   : > { %363 = vmatpush1.bf16.msra.mxu0 (!%p115_p2), %v612_v2  ;;  %591 = vmatpush1.bf16.msra.mxu1 (!%p115_p2), %v612_v2 }
   0xc   : > { %364 = vmatprep.subr.bf16.mxu0 (!%p115_p2), %v655_v1  ;;  %580 = vmatprep.subr.bf16.mxu1 (!%p115_p2), %v655_v1 }
   0xd   : > { %s803_s13 = smov (!%p138_p3, %s534_s13), 31 }
   0xe   : > { %s577_s18 = sshll.u32 %s803_s13, 3 }
   0xf   : > { %365 = vmatpush1.bf16.msra.mxu0 %v613_v3  ;;  %592 = vmatpush1.bf16.msra.mxu1 %v613_v3  ;;  %s705_s23 = scalar_lea.vmem %s799_s0, %s577_s18  ;;  %s778_s16 = scalar_lea.vmem %s801_s2, %s577_s18 }
  0x10   : > { %366 = vmatprep.subr.bf16.mxu0 %v655_v1  ;;  %581 = vmatprep.subr.bf16.mxu1 %v655_v1  ;;  %v625_v5 = vld [vmem:[%s705_s23 + $0x4] ss:$8 sps:$4 sm:$0xff]   ;;  %v623_v15 = vld [vmem:[%s705_s23] ss:$8 sps:$4 sm:$0xff]   ;;  %v629_v17 = vld [vmem:[%s705_s23 + $0x14] ss:$8 sps:$4 sm:$0xff]  }
  0x11   : > { %v628_v7 = vld [vmem:[%s705_s23 + $0x44] ss:$8 sps:$4 sm:$0xff]   ;;  %567 = vmatprep.mubr.msk.bf16.mxu0 %vm335_vm0, %v625_v5  ;;  %v626_v16 = vld [vmem:[%s705_s23 + $0x40] ss:$8 sps:$4 sm:$0xff]   ;;  %v631_v18 = vld [vmem:[%s705_s23 + $0x54] ss:$8 sps:$4 sm:$0xff]  }
  0x12   : > { %571 = vmatprep.mubr.msk.bf16.mxu1 %vm335_vm0, %v628_v7  ;;  %v633_v19 = vld [vmem:[%s705_s23 + $0x10] ss:$8 sps:$4 sm:$0xff]   ;;  %v635_v21 = vld [vmem:[%s705_s23 + $0x24] ss:$8 sps:$4 sm:$0xff]   ;;  %v639_v23 = vld [vmem:[%s705_s23 + $0x20] ss:$8 sps:$4 sm:$0xff]  }
  0x13   : > { %367 = vmatpush1.bf16.msra.mxu0 %v614_v4  ;;  %593 = vmatpush1.bf16.msra.mxu1 %v614_v4  ;;  %v634_v20 = vld [vmem:[%s705_s23 + $0x50] ss:$8 sps:$4 sm:$0xff]   ;;  %v637_v22 = vld [vmem:[%s705_s23 + $0x64] ss:$8 sps:$4 sm:$0xff]   ;;  %v640_v24 = vld [vmem:[%s705_s23 + $0x60] ss:$8 sps:$4 sm:$0xff]  }
  0x14   : > { %368 = vmatprep.subr.bf16.mxu0 %v655_v1  ;;  %582 = vmatprep.subr.bf16.mxu1 %v655_v1  ;;  %v641_v25 = vld [vmem:[%s705_s23 + $0x34] ss:$8 sps:$4 sm:$0xff]   ;;  %v645_v27 = vld [vmem:[%s705_s23 + $0x30] ss:$8 sps:$4 sm:$0xff]  }
  0x15   : > { %v643_v26 = vld [vmem:[%s705_s23 + $0x74] ss:$8 sps:$4 sm:$0xff]   ;;  %v646_v28 = vld [vmem:[%s705_s23 + $0x70] ss:$8 sps:$4 sm:$0xff]  }
  0x17   : > { %369 = vmatpush1.bf16.msra.mxu0 %v615_v6  ;;  %594 = vmatpush1.bf16.msra.mxu1 %v615_v6 }
  0x18   : > { %370 = vmatprep.subr.bf16.mxu0 %v655_v1  ;;  %583 = vmatprep.subr.bf16.mxu1 %v655_v1 }
  0x1b   : > { %371 = vmatpush1.bf16.msra.mxu0 %v616_v8  ;;  %595 = vmatpush1.bf16.msra.mxu1 %v616_v8 }
  0x1c   : > { %372 = vmatprep.subr.bf16.mxu0 %v655_v1  ;;  %584 = vmatprep.subr.bf16.mxu1 %v655_v1 }
  0x1f   : > { %373 = vmatpush1.bf16.msra.mxu0 %v617_v9  ;;  %596 = vmatpush1.bf16.msra.mxu1 %v617_v9 }
  0x20   : > { %374 = vmatprep.subr.bf16.mxu0 %v655_v1  ;;  %585 = vmatprep.subr.bf16.mxu1 %v655_v1 }
  0x23   : > { %375 = vmatpush1.bf16.msra.mxu0 %v618_v10  ;;  %597 = vmatpush1.bf16.msra.mxu1 %v618_v10 }
  0x24   : > { %376 = vmatprep.subr.bf16.mxu0 %v655_v1  ;;  %586 = vmatprep.subr.bf16.mxu1 %v655_v1 }
  0x27   : > { %377 = vmatpush1.bf16.msra.mxu0 %v619_v11  ;;  %598 = vmatpush1.bf16.msra.mxu1 %v619_v11 }
  0x28   : > { %378 = vmatprep.subr.bf16.mxu0 %v655_v1  ;;  %587 = vmatprep.subr.bf16.mxu1 %v655_v1 }
  0x2b   : > { %379 = vmatpush1.bf16.msra.mxu0 %v620_v12  ;;  %599 = vmatpush1.bf16.msra.mxu1 %v620_v12 }
  0x2c   : > { %380 = vmatprep.subr.bf16.mxu0 %v655_v1  ;;  %588 = vmatprep.subr.bf16.mxu1 %v655_v1 }
  0x2f   : > { %381 = vmatpush1.bf16.msra.mxu0 %v621_v13  ;;  %600 = vmatpush1.bf16.msra.mxu1 %v621_v13 }
  0x30   : > { %382 = vmatprep.subr.bf16.mxu0 %v655_v1  ;;  %589 = vmatprep.subr.bf16.mxu1 %v655_v1 }
  0x33   : > { %383 = vmatpush1.bf16.msra.mxu0 %v622_v14  ;;  %601 = vmatpush1.bf16.msra.mxu1 %v622_v14 }
  0x36   : > { %393 = vmatmul.mubr.bf16.vlgmr.msra.gmra.mrb[0].mxu0 %v623_v15  ;;  %425 = vmatmul.mubr.bf16.vlgmr.msra.gmra.mrb[0].mxu1 %v626_v16 }
  0x37   : > { %568 = vmatprep.mubr.msk.bf16.mxu0 %vm335_vm0, %v629_v17  ;;  %572 = vmatprep.mubr.msk.bf16.mxu1 %vm335_vm0, %v631_v18 }
  0x3e   : > { %401 = vmatmul.mubr.bf16.gmra.mrb[4].mxu0 %v633_v19  ;;  %433 = vmatmul.mubr.bf16.gmra.mrb[4].mxu1 %v634_v20 }
  0x3f   : > { %569 = vmatprep.mubr.msk.bf16.mxu0 %vm335_vm0, %v635_v21  ;;  %573 = vmatprep.mubr.msk.bf16.mxu1 %vm335_vm0, %v637_v22 }
  0x46   : > { %409 = vmatmul.mubr.bf16.gmra.mrb[8].mxu0 %v639_v23  ;;  %441 = vmatmul.mubr.bf16.gmra.mrb[8].mxu1 %v640_v24 }
  0x47   : > { %570 = vmatprep.mubr.msk.bf16.mxu0 %vm335_vm0, %v641_v25  ;;  %574 = vmatprep.mubr.msk.bf16.mxu1 %vm335_vm0, %v643_v26 }
  0x4e   : > { %417 = vmatmul.mubr.bf16.gmra.mrb[12].mxu0 %v645_v27  ;;  %449 = vmatmul.mubr.bf16.gmra.mrb[12].mxu1 %v646_v28 }
 0x109   : > { %v394_v29 = vpop.f32.mrb[0].mxu0  ;;  %v426_v30 = vpop.f32.mrb[0].mxu1 }
 0x10a   : > { %457 = vst [vmem:[%s778_s16] sm:$0xff] %v394_v29  ;;  %465 = vst [vmem:[%s778_s16 + $0x40] sm:$0xff] %v426_v30  ;;  %v396_v31 = vpop.f32.mrb[1].mxu0  ;;  %v428_v32 = vpop.f32.mrb[1].mxu1 }
 0x10b   : > { %v397_v33 = vpop.f32.mrb[2].mxu0  ;;  %v429_v34 = vpop.f32.mrb[2].mxu1 }
 0x10c   : > { %458 = vst [vmem:[%s778_s16 + $0x8] sm:$0xff] %v397_v33  ;;  %466 = vst [vmem:[%s778_s16 + $0x48] sm:$0xff] %v429_v34  ;;  %v399_v35 = vpop.f32.mrb[3].mxu0  ;;  %v431_v36 = vpop.f32.mrb[3].mxu1 }
 0x111   : > { %v402_v37 = vpop.f32.mrb[4].mxu0  ;;  %v434_v38 = vpop.f32.mrb[4].mxu1 }
 0x112   : > { %459 = vst [vmem:[%s778_s16 + $0x10] sm:$0xff] %v402_v37  ;;  %467 = vst [vmem:[%s778_s16 + $0x50] sm:$0xff] %v434_v38  ;;  %v404_v39 = vpop.f32.mrb[5].mxu0  ;;  %v436_v40 = vpop.f32.mrb[5].mxu1 }
 0x113   : > { %v405_v41 = vpop.f32.mrb[6].mxu0  ;;  %v437_v42 = vpop.f32.mrb[6].mxu1 }
 0x114   : > { %460 = vst [vmem:[%s778_s16 + $0x18] sm:$0xff] %v405_v41  ;;  %468 = vst [vmem:[%s778_s16 + $0x58] sm:$0xff] %v437_v42  ;;  %v407_v43 = vpop.f32.mrb[7].mxu0  ;;  %v439_v44 = vpop.f32.mrb[7].mxu1 }
 0x119   : > { %v410_v45 = vpop.f32.mrb[8].mxu0  ;;  %v442_v46 = vpop.f32.mrb[8].mxu1 }
 0x11a   : > { %461 = vst [vmem:[%s778_s16 + $0x20] sm:$0xff] %v410_v45  ;;  %469 = vst [vmem:[%s778_s16 + $0x60] sm:$0xff] %v442_v46  ;;  %v412_v47 = vpop.f32.mrb[9].mxu0  ;;  %v444_v48 = vpop.f32.mrb[9].mxu1 }
 0x11b   : > { %v413_v49 = vpop.f32.mrb[10].mxu0  ;;  %v445_v50 = vpop.f32.mrb[10].mxu1 }
 0x11c   : > { %462 = vst [vmem:[%s778_s16 + $0x28] sm:$0xff] %v413_v49  ;;  %470 = vst [vmem:[%s778_s16 + $0x68] sm:$0xff] %v445_v50  ;;  %v415_v51 = vpop.f32.mrb[11].mxu0  ;;  %v447_v52 = vpop.f32.mrb[11].mxu1 }
 0x121   : > { %v418_v53 = vpop.f32.mrb[12].mxu0  ;;  %v450_v54 = vpop.f32.mrb[12].mxu1 }
 0x122   : > { %463 = vst [vmem:[%s778_s16 + $0x30] sm:$0xff] %v418_v53  ;;  %471 = vst [vmem:[%s778_s16 + $0x70] sm:$0xff] %v450_v54  ;;  %v420_v55 = vpop.f32.mrb[13].mxu0  ;;  %v452_v56 = vpop.f32.mrb[13].mxu1 }
 0x123   : > { %v421_v57 = vpop.f32.mrb[14].mxu0  ;;  %v453_v58 = vpop.f32.mrb[14].mxu1 }
 0x124   : > { %464 = vst [vmem:[%s778_s16 + $0x38] sm:$0xff] %v421_v57  ;;  %472 = vst [vmem:[%s778_s16 + $0x78] sm:$0xff] %v453_v58  ;;  %v423_v59 = vpop.f32.mrb[15].mxu0  ;;  %v455_v60 = vpop.f32.mrb[15].mxu1 }
 0x125 PF: > { %s12_s9 = sadd.s32 1, %s653_s9  }
 0x126   : > { %p9_p4 = scmp.ge.s32.totalorder %s12_s9, 4  }
 0x128   :  { %11 = sbr.rel (!%p9_p4) target bundleno = 1 (0x1), region = 58 }

</bundles_post_ra>
